<compile_context>
chip_gen: v7x
topology: tpu7x:2x2x1
jax: 0.10.0
libtpu: 0.0.40
codegen_flags: <defaults>
</compile_context>

<pallas_src>
import jax
import jax.numpy as jnp
from jax import lax
from jax.experimental import pallas as pl

SHARED_DIM = 128
PRIME_DIM = 16
BN_EPS = 1e-5


def _uni_kernel(xt_ref, xi_ref, w1_ref, bn1_ref, w2_ref, bn2_ref, ot_ref, oi_ref):
    """Both modality branches in one invocation.

    Per branch: matmul (bf16 operands, f32 acc) -> batch-stat BN (f32) -> ReLU
                -> matmul -> batch-stat BN -> ReLU.
    Linear biases are omitted (exactly cancelled by the mean subtraction of the
    following training-mode BatchNorm).
    """

    def branch(x_ref, m, o_ref):
        x = x_ref[...].astype(jnp.bfloat16)        # (B, 128)
        bn1 = bn1_ref[m]                           # (2, 128): row0=gamma, row1=beta
        bn2 = bn2_ref[m]                           # (2, 16)

        # ---- Linear(shared, shared) (bias cancelled by the BN below) ----
        h = jnp.dot(x, w1_ref[m], preferred_element_type=jnp.float32)

        # ---- BatchNorm1d(shared), training-mode (biased batch variance) ----
        mean1 = jnp.mean(h, axis=0, keepdims=True)
        var1 = jnp.mean(jnp.square(h - mean1), axis=0, keepdims=True)
        h = (h - mean1) * lax.rsqrt(var1 + BN_EPS) * bn1[0:1, :] + bn1[1:2, :]
        h = jnp.maximum(h, 0.0)                    # ReLU

        # ---- Linear(shared, prime) -> BatchNorm1d(prime) -> ReLU ----
        z = jnp.dot(h.astype(jnp.bfloat16), w2_ref[m],
                    preferred_element_type=jnp.float32)
        mean2 = jnp.mean(z, axis=0, keepdims=True)
        var2 = jnp.mean(jnp.square(z - mean2), axis=0, keepdims=True)
        z = (z - mean2) * lax.rsqrt(var2 + BN_EPS) * bn2[0:1, :] + bn2[1:2, :]
        o_ref[...] = jnp.maximum(z, 0.0).astype(o_ref.dtype)

    branch(xt_ref, 0, ot_ref)
    branch(xi_ref, 1, oi_ref)


def unimodal_detection(text_encoding, image_encoding, packed_params):
    """Hot-path forward.  `packed_params` comes from prepare_params() (built once)."""
    w1, bn1, w2, bn2 = packed_params
    B = text_encoding.shape[0]
    assert B > 1, "BatchNorm1d training-mode semantics require batch size > 1"

    flops = 2 * (2 * B * SHARED_DIM * SHARED_DIM + 2 * B * SHARED_DIM * PRIME_DIM)
    bytes_accessed = (2 * B * SHARED_DIM * 4          # activations in (f32)
                      + w1.size * 2 + w2.size * 2     # bf16 weights
                      + bn1.size * 4 + bn2.size * 4   # BN params (f32)
                      + 2 * B * PRIME_DIM * 4)        # outputs (f32)
    cost = pl.CostEstimate(flops=flops,
                           transcendentals=2 * (SHARED_DIM + PRIME_DIM),
                           bytes_accessed=bytes_accessed)

    # Single invocation (no grid): whole operands live in VMEM (~0.1 MiB total),
    # so there is nothing to pipeline and no per-grid-step overhead.
    # TODO(synk): if B grows large, add a batch grid axis ("arbitrary"), keep the
    # weights resident via index_map, and do a two-pass BN with sum/sumsq scratch.
    text_prime, image_prime = pl.pallas_call(
        _uni_kernel,
        out_shape=(jax.ShapeDtypeStruct((B, PRIME_DIM), jnp.float32),
                   jax.ShapeDtypeStruct((B, PRIME_DIM), jnp.float32)),
        cost_estimate=cost,
    )(text_encoding, image_encoding, w1, bn1, w2, bn2)
    return text_prime, image_prime


def init_branch_params(key, shared_dim=SHARED_DIM, prime_dim=PRIME_DIM):
    """PyTorch-default-style init for one branch.  Linear weights stored
    pre-transposed (y = x @ W + b); BN gamma=1, beta=0; vectors kept 1-D."""
    k1, k2, k3, k4 = jax.random.split(key, 4)
    bound = 1.0 / (shared_dim ** 0.5)
    w1 = jax.random.uniform(k1, (shared_dim, shared_dim), jnp.float32, -bound, bound)
    b1 = jax.random.uniform(k2, (shared_dim,), jnp.float32, -bound, bound)
    g1 = jnp.ones((shared_dim,), jnp.float32)
    be1 = jnp.zeros((shared_dim,), jnp.float32)

    w2 = jax.random.uniform(k3, (shared_dim, prime_dim), jnp.float32, -bound, bound)
    b2 = jax.random.uniform(k4, (prime_dim,), jnp.float32, -bound, bound)
    g2 = jnp.ones((prime_dim,), jnp.float32)
    be2 = jnp.zeros((prime_dim,), jnp.float32)
    return (w1, b1, g1, be1, w2, b2, g2, be2)


def prepare_params(text_params, image_params):
    """One-time packing (off the hot path): stack modalities, drop the Linear
    biases (cancelled by the batch-stat BN), pack BN gamma/beta together, and
    store matmul weights as bf16 for the MXU."""
    tw1, _tb1, tg1, tbe1, tw2, _tb2, tg2, tbe2 = text_params
    iw1, _ib1, ig1, ibe1, iw2, _ib2, ig2, ibe2 = image_params
    w1 = jnp.stack([tw1, iw1]).astype(jnp.bfloat16)                       # (2,128,128)
    w2 = jnp.stack([tw2, iw2]).astype(jnp.bfloat16)                       # (2,128,16)
    bn1 = jnp.stack([jnp.stack([tg1, tbe1]), jnp.stack([ig1, ibe1])])     # (2,2,128) f32
    bn2 = jnp.stack([jnp.stack([tg2, tbe2]), jnp.stack([ig2, ibe2])])     # (2,2,16)  f32
    return w1, bn1, w2, bn2


def _branch_ref(x, params, matmul_dtype=jnp.float32):
    """Pure-JAX reference of one PyTorch branch (training-mode BatchNorm, biases
    included).  matmul_dtype=bfloat16 mirrors the kernel's MXU operand dtype."""
    w1, b1, g1, be1, w2, b2, g2, be2 = params
    h = jnp.dot(x.astype(matmul_dtype), w1.astype(matmul_dtype),
                preferred_element_type=jnp.float32) + b1
    m1 = jnp.mean(h, axis=0, keepdims=True)
    v1 = jnp.mean((h - m1) ** 2, axis=0, keepdims=True)
    h = jnp.maximum((h - m1) * lax.rsqrt(v1 + BN_EPS) * g1 + be1, 0.0)
    z = jnp.dot(h.astype(matmul_dtype), w2.astype(matmul_dtype),
                preferred_element_type=jnp.float32) + b2
    m2 = jnp.mean(z, axis=0, keepdims=True)
    v2 = jnp.mean((z - m2) ** 2, axis=0, keepdims=True)
    return jnp.maximum((z - m2) * lax.rsqrt(v2 + BN_EPS) * g2 + be2, 0.0)


if __name__ == "__main__":
    key = jax.random.PRNGKey(0)
    k_tp, k_ip, k_tx, k_ix = jax.random.split(key, 4)

    B = 8  # BatchNorm1d training-mode semantics require B > 1
    text_params = init_branch_params(k_tp)
    image_params = init_branch_params(k_ip)

    # One-time parameter packing, off the hot path.
    packed = prepare_params(text_params, image_params)
    jax.block_until_ready(packed)

    text_encoding = jax.random.normal(k_tx, (B, SHARED_DIM), jnp.float32)
    image_encoding = jax.random.normal(k_ix, (B, SHARED_DIM), jnp.float32)

    text_prime, image_prime = unimodal_detection(text_encoding, image_encoding, packed)
    jax.block_until_ready((text_prime, image_prime))

    assert text_prime.shape == (B, PRIME_DIM)
    assert image_prime.shape == (B, PRIME_DIM)

    # (1) Tight check vs a reference mirroring the kernel's bf16 matmul operands
    #     (biases included -> also verifies the bias-cancellation optimization).
    t_mir = _branch_ref(text_encoding, text_params, matmul_dtype=jnp.bfloat16)
    i_mir = _branch_ref(image_encoding, image_params, matmul_dtype=jnp.bfloat16)
    assert jnp.allclose(text_prime, t_mir, rtol=2e-3, atol=2e-3)
    assert jnp.allclose(image_prime, i_mir, rtol=2e-3, atol=2e-3)

    # (2) Loose check vs the exact f32 PyTorch-semantics reference (bounds the
    #     bf16-matmul approximation error).
    t_ref = _branch_ref(text_encoding, text_params, matmul_dtype=jnp.float32)
    i_ref = _branch_ref(image_encoding, image_params, matmul_dtype=jnp.float32)
    assert jnp.allclose(text_prime, t_ref, rtol=5e-2, atol=5e-2)
    assert jnp.allclose(image_prime, i_ref, rtol=5e-2, atol=5e-2)

    print("KERNEL_OK")
</pallas_src>

<mosaic_0001>
module attributes {stable_mosaic.version = 11 : i64} {
  func.func @_uni_kernel(%arg0: memref<8x128xf32, #tpu.memory_space<vmem>>, %arg1: memref<8x128xf32, #tpu.memory_space<vmem>>, %arg2: memref<2x128x128xbf16, #tpu.memory_space<vmem>>, %arg3: memref<2x2x128xf32, #tpu.memory_space<vmem>>, %arg4: memref<2x128x16xbf16, #tpu.memory_space<vmem>>, %arg5: memref<2x2x16xf32, #tpu.memory_space<vmem>>, %arg6: memref<8x16xf32, #tpu.memory_space<vmem>>, %arg7: memref<8x16xf32, #tpu.memory_space<vmem>>) attributes {dimension_semantics = [], scalar_prefetch = 0 : i64, scratch_operands = 0 : i64, tpu.core_type = #tpu.core_type<tc>} {
    %c0 = arith.constant 0 : index
    %c0_0 = arith.constant 0 : index
    %0 = vector.load %arg0[%c0, %c0_0] : memref<8x128xf32, #tpu.memory_space<vmem>>, vector<8x128xf32>
    %1 = arith.truncf %0 : vector<8x128xf32> to vector<8x128xbf16>
    %c0_1 = arith.constant 0 : index
    %c0_2 = arith.constant 0 : index
    %c0_3 = arith.constant 0 : index
    %2 = vector.load %arg3[%c0_1, %c0_2, %c0_3] : memref<2x2x128xf32, #tpu.memory_space<vmem>>, vector<1x2x128xf32>
    %3 = vector.shape_cast %2 : vector<1x2x128xf32> to vector<2x128xf32>
    %c0_4 = arith.constant 0 : index
    %c0_5 = arith.constant 0 : index
    %c0_6 = arith.constant 0 : index
    %4 = vector.load %arg5[%c0_4, %c0_5, %c0_6] : memref<2x2x16xf32, #tpu.memory_space<vmem>>, vector<1x2x16xf32>
    %5 = vector.shape_cast %4 : vector<1x2x16xf32> to vector<2x16xf32>
    %c0_7 = arith.constant 0 : index
    %c0_8 = arith.constant 0 : index
    %c0_9 = arith.constant 0 : index
    %6 = vector.load %arg2[%c0_7, %c0_8, %c0_9] : memref<2x128x128xbf16, #tpu.memory_space<vmem>>, vector<1x128x128xbf16>
    %7 = vector.shape_cast %6 : vector<1x128x128xbf16> to vector<128x128xbf16>
    %cst = arith.constant dense<0.000000e+00> : vector<8x128xf32>
    %8 = tpu.matmul %1, %7, %cst {dimension_numbers = #tpu.dot_dimension_numbers<[1], [0], [0], [1], [0, 0, 1, 1], [], []>} : vector<8x128xbf16>, vector<128x128xbf16>, vector<8x128xf32> -> vector<8x128xf32>
    %cst_10 = arith.constant dense<0.000000e+00> : vector<128xf32>
    %9 = vector.multi_reduction <add>, %8, %cst_10 [0] : vector<8x128xf32> to vector<128xf32>
    %10 = vector.shape_cast %9 : vector<128xf32> to vector<1x128xf32>
    %cst_11 = arith.constant 8.000000e+00 : f32
    %11 = vector.broadcast %cst_11 : f32 to vector<1x128xf32>
    %12 = arith.divf %10, %11 : vector<1x128xf32>
    %13 = vector.broadcast %12 : vector<1x128xf32> to vector<8x128xf32>
    %14 = arith.subf %8, %13 : vector<8x128xf32>
    %15 = arith.mulf %14, %14 : vector<8x128xf32>
    %cst_12 = arith.constant dense<0.000000e+00> : vector<128xf32>
    %16 = vector.multi_reduction <add>, %15, %cst_12 [0] : vector<8x128xf32> to vector<128xf32>
    %17 = vector.shape_cast %16 : vector<128xf32> to vector<1x128xf32>
    %cst_13 = arith.constant 8.000000e+00 : f32
    %18 = vector.broadcast %cst_13 : f32 to vector<1x128xf32>
    %19 = arith.divf %17, %18 : vector<1x128xf32>
    %20 = vector.broadcast %12 : vector<1x128xf32> to vector<8x128xf32>
    %21 = arith.subf %8, %20 : vector<8x128xf32>
    %cst_14 = arith.constant 9.99999974E-6 : f32
    %22 = vector.broadcast %cst_14 : f32 to vector<1x128xf32>
    %23 = arith.addf %19, %22 : vector<1x128xf32>
    %24 = math.rsqrt %23 : vector<1x128xf32>
    %25 = vector.broadcast %24 : vector<1x128xf32> to vector<8x128xf32>
    %26 = arith.mulf %21, %25 : vector<8x128xf32>
    %27 = vector.extract_strided_slice %3 {offsets = [0, 0], sizes = [1, 128], strides = [1, 1]} : vector<2x128xf32> to vector<1x128xf32>
    %28 = vector.broadcast %27 : vector<1x128xf32> to vector<8x128xf32>
    %29 = arith.mulf %26, %28 : vector<8x128xf32>
    %30 = vector.extract_strided_slice %3 {offsets = [1, 0], sizes = [1, 128], strides = [1, 1]} : vector<2x128xf32> to vector<1x128xf32>
    %31 = vector.broadcast %30 : vector<1x128xf32> to vector<8x128xf32>
    %32 = arith.addf %29, %31 : vector<8x128xf32>
    %cst_15 = arith.constant 0.000000e+00 : f32
    %33 = vector.broadcast %cst_15 : f32 to vector<8x128xf32>
    %34 = arith.maximumf %32, %33 : vector<8x128xf32>
    %35 = arith.truncf %34 : vector<8x128xf32> to vector<8x128xbf16>
    %c0_16 = arith.constant 0 : index
    %c0_17 = arith.constant 0 : index
    %c0_18 = arith.constant 0 : index
    %36 = vector.load %arg4[%c0_16, %c0_17, %c0_18] : memref<2x128x16xbf16, #tpu.memory_space<vmem>>, vector<1x128x16xbf16>
    %37 = vector.shape_cast %36 : vector<1x128x16xbf16> to vector<128x16xbf16>
    %cst_19 = arith.constant dense<0.000000e+00> : vector<8x16xf32>
    %38 = tpu.matmul %35, %37, %cst_19 {dimension_numbers = #tpu.dot_dimension_numbers<[1], [0], [0], [1], [0, 0, 1, 1], [], []>} : vector<8x128xbf16>, vector<128x16xbf16>, vector<8x16xf32> -> vector<8x16xf32>
    %cst_20 = arith.constant dense<0.000000e+00> : vector<16xf32>
    %39 = vector.multi_reduction <add>, %38, %cst_20 [0] : vector<8x16xf32> to vector<16xf32>
    %40 = vector.shape_cast %39 : vector<16xf32> to vector<1x16xf32>
    %cst_21 = arith.constant 8.000000e+00 : f32
    %41 = vector.broadcast %cst_21 : f32 to vector<1x16xf32>
    %42 = arith.divf %40, %41 : vector<1x16xf32>
    %43 = vector.broadcast %42 : vector<1x16xf32> to vector<8x16xf32>
    %44 = arith.subf %38, %43 : vector<8x16xf32>
    %45 = arith.mulf %44, %44 : vector<8x16xf32>
    %cst_22 = arith.constant dense<0.000000e+00> : vector<16xf32>
    %46 = vector.multi_reduction <add>, %45, %cst_22 [0] : vector<8x16xf32> to vector<16xf32>
    %47 = vector.shape_cast %46 : vector<16xf32> to vector<1x16xf32>
    %cst_23 = arith.constant 8.000000e+00 : f32
    %48 = vector.broadcast %cst_23 : f32 to vector<1x16xf32>
    %49 = arith.divf %47, %48 : vector<1x16xf32>
    %50 = vector.broadcast %42 : vector<1x16xf32> to vector<8x16xf32>
    %51 = arith.subf %38, %50 : vector<8x16xf32>
    %cst_24 = arith.constant 9.99999974E-6 : f32
    %52 = vector.broadcast %cst_24 : f32 to vector<1x16xf32>
    %53 = arith.addf %49, %52 : vector<1x16xf32>
    %54 = math.rsqrt %53 : vector<1x16xf32>
    %55 = vector.broadcast %54 : vector<1x16xf32> to vector<8x16xf32>
    %56 = arith.mulf %51, %55 : vector<8x16xf32>
    %57 = vector.extract_strided_slice %5 {offsets = [0, 0], sizes = [1, 16], strides = [1, 1]} : vector<2x16xf32> to vector<1x16xf32>
    %58 = vector.broadcast %57 : vector<1x16xf32> to vector<8x16xf32>
    %59 = arith.mulf %56, %58 : vector<8x16xf32>
    %60 = vector.extract_strided_slice %5 {offsets = [1, 0], sizes = [1, 16], strides = [1, 1]} : vector<2x16xf32> to vector<1x16xf32>
    %61 = vector.broadcast %60 : vector<1x16xf32> to vector<8x16xf32>
    %62 = arith.addf %59, %61 : vector<8x16xf32>
    %cst_25 = arith.constant 0.000000e+00 : f32
    %63 = vector.broadcast %cst_25 : f32 to vector<8x16xf32>
    %64 = arith.maximumf %62, %63 : vector<8x16xf32>
    %c0_26 = arith.constant 0 : index
    %c0_27 = arith.constant 0 : index
    %65 = vector.load %arg6[%c0_26, %c0_27] : memref<8x16xf32, #tpu.memory_space<vmem>>, vector<8x16xf32>
    tpu.vector_store %arg6[%c0_26, %c0_27], %64 {strides = array<i32>} : memref<8x16xf32, #tpu.memory_space<vmem>>, vector<8x16xf32>,
    %c0_28 = arith.constant 0 : index
    %c0_29 = arith.constant 0 : index
    %66 = vector.load %arg1[%c0_28, %c0_29] : memref<8x128xf32, #tpu.memory_space<vmem>>, vector<8x128xf32>
    %67 = arith.truncf %66 : vector<8x128xf32> to vector<8x128xbf16>
    %c1 = arith.constant 1 : index
    %c0_30 = arith.constant 0 : index
    %c0_31 = arith.constant 0 : index
    %68 = vector.load %arg3[%c1, %c0_30, %c0_31] : memref<2x2x128xf32, #tpu.memory_space<vmem>>, vector<1x2x128xf32>
    %69 = vector.shape_cast %68 : vector<1x2x128xf32> to vector<2x128xf32>
    %c1_32 = arith.constant 1 : index
    %c0_33 = arith.constant 0 : index
    %c0_34 = arith.constant 0 : index
    %70 = vector.load %arg5[%c1_32, %c0_33, %c0_34] : memref<2x2x16xf32, #tpu.memory_space<vmem>>, vector<1x2x16xf32>
    %71 = vector.shape_cast %70 : vector<1x2x16xf32> to vector<2x16xf32>
    %c1_35 = arith.constant 1 : index
    %c0_36 = arith.constant 0 : index
    %c0_37 = arith.constant 0 : index
    %72 = vector.load %arg2[%c1_35, %c0_36, %c0_37] : memref<2x128x128xbf16, #tpu.memory_space<vmem>>, vector<1x128x128xbf16>
    %73 = vector.shape_cast %72 : vector<1x128x128xbf16> to vector<128x128xbf16>
    %cst_38 = arith.constant dense<0.000000e+00> : vector<8x128xf32>
    %74 = tpu.matmul %67, %73, %cst_38 {dimension_numbers = #tpu.dot_dimension_numbers<[1], [0], [0], [1], [0, 0, 1, 1], [], []>} : vector<8x128xbf16>, vector<128x128xbf16>, vector<8x128xf32> -> vector<8x128xf32>
    %cst_39 = arith.constant dense<0.000000e+00> : vector<128xf32>
    %75 = vector.multi_reduction <add>, %74, %cst_39 [0] : vector<8x128xf32> to vector<128xf32>
    %76 = vector.shape_cast %75 : vector<128xf32> to vector<1x128xf32>
    %cst_40 = arith.constant 8.000000e+00 : f32
    %77 = vector.broadcast %cst_40 : f32 to vector<1x128xf32>
    %78 = arith.divf %76, %77 : vector<1x128xf32>
    %79 = vector.broadcast %78 : vector<1x128xf32> to vector<8x128xf32>
    %80 = arith.subf %74, %79 : vector<8x128xf32>
    %81 = arith.mulf %80, %80 : vector<8x128xf32>
    %cst_41 = arith.constant dense<0.000000e+00> : vector<128xf32>
    %82 = vector.multi_reduction <add>, %81, %cst_41 [0] : vector<8x128xf32> to vector<128xf32>
    %83 = vector.shape_cast %82 : vector<128xf32> to vector<1x128xf32>
    %cst_42 = arith.constant 8.000000e+00 : f32
    %84 = vector.broadcast %cst_42 : f32 to vector<1x128xf32>
    %85 = arith.divf %83, %84 : vector<1x128xf32>
    %86 = vector.broadcast %78 : vector<1x128xf32> to vector<8x128xf32>
    %87 = arith.subf %74, %86 : vector<8x128xf32>
    %cst_43 = arith.constant 9.99999974E-6 : f32
    %88 = vector.broadcast %cst_43 : f32 to vector<1x128xf32>
    %89 = arith.addf %85, %88 : vector<1x128xf32>
    %90 = math.rsqrt %89 : vector<1x128xf32>
    %91 = vector.broadcast %90 : vector<1x128xf32> to vector<8x128xf32>
    %92 = arith.mulf %87, %91 : vector<8x128xf32>
    %93 = vector.extract_strided_slice %69 {offsets = [0, 0], sizes = [1, 128], strides = [1, 1]} : vector<2x128xf32> to vector<1x128xf32>
    %94 = vector.broadcast %93 : vector<1x128xf32> to vector<8x128xf32>
    %95 = arith.mulf %92, %94 : vector<8x128xf32>
    %96 = vector.extract_strided_slice %69 {offsets = [1, 0], sizes = [1, 128], strides = [1, 1]} : vector<2x128xf32> to vector<1x128xf32>
    %97 = vector.broadcast %96 : vector<1x128xf32> to vector<8x128xf32>
    %98 = arith.addf %95, %97 : vector<8x128xf32>
    %cst_44 = arith.constant 0.000000e+00 : f32
    %99 = vector.broadcast %cst_44 : f32 to vector<8x128xf32>
    %100 = arith.maximumf %98, %99 : vector<8x128xf32>
    %101 = arith.truncf %100 : vector<8x128xf32> to vector<8x128xbf16>
    %c1_45 = arith.constant 1 : index
    %c0_46 = arith.constant 0 : index
    %c0_47 = arith.constant 0 : index
    %102 = vector.load %arg4[%c1_45, %c0_46, %c0_47] : memref<2x128x16xbf16, #tpu.memory_space<vmem>>, vector<1x128x16xbf16>
    %103 = vector.shape_cast %102 : vector<1x128x16xbf16> to vector<128x16xbf16>
    %cst_48 = arith.constant dense<0.000000e+00> : vector<8x16xf32>
    %104 = tpu.matmul %101, %103, %cst_48 {dimension_numbers = #tpu.dot_dimension_numbers<[1], [0], [0], [1], [0, 0, 1, 1], [], []>} : vector<8x128xbf16>, vector<128x16xbf16>, vector<8x16xf32> -> vector<8x16xf32>
    %cst_49 = arith.constant dense<0.000000e+00> : vector<16xf32>
    %105 = vector.multi_reduction <add>, %104, %cst_49 [0] : vector<8x16xf32> to vector<16xf32>
    %106 = vector.shape_cast %105 : vector<16xf32> to vector<1x16xf32>
    %cst_50 = arith.constant 8.000000e+00 : f32
    %107 = vector.broadcast %cst_50 : f32 to vector<1x16xf32>
    %108 = arith.divf %106, %107 : vector<1x16xf32>
    %109 = vector.broadcast %108 : vector<1x16xf32> to vector<8x16xf32>
    %110 = arith.subf %104, %109 : vector<8x16xf32>
    %111 = arith.mulf %110, %110 : vector<8x16xf32>
    %cst_51 = arith.constant dense<0.000000e+00> : vector<16xf32>
    %112 = vector.multi_reduction <add>, %111, %cst_51 [0] : vector<8x16xf32> to vector<16xf32>
    %113 = vector.shape_cast %112 : vector<16xf32> to vector<1x16xf32>
    %cst_52 = arith.constant 8.000000e+00 : f32
    %114 = vector.broadcast %cst_52 : f32 to vector<1x16xf32>
    %115 = arith.divf %113, %114 : vector<1x16xf32>
    %116 = vector.broadcast %108 : vector<1x16xf32> to vector<8x16xf32>
    %117 = arith.subf %104, %116 : vector<8x16xf32>
    %cst_53 = arith.constant 9.99999974E-6 : f32
    %118 = vector.broadcast %cst_53 : f32 to vector<1x16xf32>
    %119 = arith.addf %115, %118 : vector<1x16xf32>
    %120 = math.rsqrt %119 : vector<1x16xf32>
    %121 = vector.broadcast %120 : vector<1x16xf32> to vector<8x16xf32>
    %122 = arith.mulf %117, %121 : vector<8x16xf32>
    %123 = vector.extract_strided_slice %71 {offsets = [0, 0], sizes = [1, 16], strides = [1, 1]} : vector<2x16xf32> to vector<1x16xf32>
    %124 = vector.broadcast %123 : vector<1x16xf32> to vector<8x16xf32>
    %125 = arith.mulf %122, %124 : vector<8x16xf32>
    %126 = vector.extract_strided_slice %71 {offsets = [1, 0], sizes = [1, 16], strides = [1, 1]} : vector<2x16xf32> to vector<1x16xf32>
    %127 = vector.broadcast %126 : vector<1x16xf32> to vector<8x16xf32>
    %128 = arith.addf %125, %127 : vector<8x16xf32>
    %cst_54 = arith.constant 0.000000e+00 : f32
    %129 = vector.broadcast %cst_54 : f32 to vector<8x16xf32>
    %130 = arith.maximumf %128, %129 : vector<8x16xf32>
    %c0_55 = arith.constant 0 : index
    %c0_56 = arith.constant 0 : index
    %131 = vector.load %arg7[%c0_55, %c0_56] : memref<8x16xf32, #tpu.memory_space<vmem>>, vector<8x16xf32>
    tpu.vector_store %arg7[%c0_55, %c0_56], %130 {strides = array<i32>} : memref<8x16xf32, #tpu.memory_space<vmem>>, vector<8x16xf32>,
    return
  }
}

</mosaic_0001>

<bundles_post_ra>
// kernel: tpu_custom_call.1
= control target key start
LH: loop header
LB: loop body
LE: loop exit
PB: predicated region body
PF: predicated region fallthrough
CT: control target
= control target key end

     0   :  { %13 = vsyncpa [#allocation3], 0  ;;  %v888_v1 = vmov 0.0   ;;  %vm889_vm0 = vmmov 0   ;;  %s1128_s0 = inlined_call_operand.vmem [shape: f32[8,128], index: 0, kind: input, shape index: {}]   ;;  %s1129_s1 = inlined_call_operand.vmem [shape: f32[8,128], index: 1, kind: input, shape index: {}]   ;;  %s1130_s2 = inlined_call_operand.vmem [shape: bf16[2,128,128], index: 2, kind: input, shape index: {}]   ;;  %s1131_s3 = inlined_call_operand.vmem [shape: f32[2,2,128], index: 3, kind: input, shape index: {}]   ;;  %s1132_s4 = inlined_call_operand.vmem [shape: bf16[2,128,16], index: 4, kind: input, shape index: {}]   ;;  %s1133_s5 = inlined_call_operand.vmem [shape: f32[2,2,16], index: 5, kind: input, shape index: {}]   ;;  %s1134_s6 = inlined_call_operand.hbm [shape: f32[8,16], index: 6, kind: output, shape index: {0}]   ;;  %s1135_s7 = inlined_call_operand.hbm [shape: f32[8,16], index: 7, kind: output, shape index: {1}]  }
   0x1   :  { %v800_v0 = vld [vmem:[%s1130_s2] sm:$0xff]   ;;  %716 = vmatprep.subr.bf16.mxu0 %v888_v1  ;;  %736 = vmatprep.subr.bf16.mxu1 %v888_v1  ;;  %v801_v2 = vld [vmem:[%s1130_s2 + $0x8] sm:$0xff]   ;;  %v802_v3 = vld [vmem:[%s1130_s2 + $0x10] sm:$0xff]  }
   0x2   :  { %717 = vmatpush3.bf16.msra.mxu0 %v800_v0  ;;  %732 = vmatprep.mubr.msk.bf16.mxu0 %vm889_vm0, %v888_v1  ;;  %v803_v4 = vld [vmem:[%s1130_s2 + $0x18] sm:$0xff]   ;;  %v804_v5 = vld [vmem:[%s1130_s2 + $0x20] sm:$0xff]   ;;  %v805_v6 = vld [vmem:[%s1130_s2 + $0x28] sm:$0xff]  }
   0x3   :  { %718 = vmatprep.subr.bf16.mxu0 %v888_v1  ;;  %752 = vmatprep.mubr.msk.bf16.mxu1 %vm889_vm0, %v888_v1  ;;  %v806_v7 = vld [vmem:[%s1130_s2 + $0x30] sm:$0xff]   ;;  %v807_v8 = vld [vmem:[%s1130_s2 + $0x38] sm:$0xff]   ;;  %v28_v9 = vld [vmem:[%s1128_s0] sm:$0xff] }
   0x6   :  { %719 = vmatpush3.bf16.msra.mxu0 %v801_v2 }
   0x7   :  { %720 = vmatprep.subr.bf16.mxu0 %v888_v1 }
   0xa   :  { %721 = vmatpush3.bf16.msra.mxu0 %v802_v3 }
   0xb   :  { %722 = vmatprep.subr.bf16.mxu0 %v888_v1 }
   0xe   :  { %723 = vmatpush3.bf16.msra.mxu0 %v803_v4 }
   0xf   :  { %724 = vmatprep.subr.bf16.mxu0 %v888_v1 }
  0x12   :  { %725 = vmatpush3.bf16.msra.mxu0 %v804_v5 }
  0x13   :  { %726 = vmatprep.subr.bf16.mxu0 %v888_v1 }
  0x16   :  { %727 = vmatpush3.bf16.msra.mxu0 %v805_v6 }
  0x17   :  { %728 = vmatprep.subr.bf16.mxu0 %v888_v1 }
  0x1a   :  { %729 = vmatpush3.bf16.msra.mxu0 %v806_v7 }
  0x1b   :  { %730 = vmatprep.subr.bf16.mxu0 %v888_v1 }
  0x1c   :  { %14 = vsyncpa [#allocation5], 0  ;;  %v29_v10 = vpack.c.bf16 %v28_v9, %v28_v9  ;;  %v808_v11 = vld [vmem:[%s1130_s2 + $0x40] sm:$0xff]   ;;  %v809_v12 = vld [vmem:[%s1130_s2 + $0x48] sm:$0xff]   ;;  %v156_v49 = vlaneseq  ;;  %vm272_vm1 = vcmask 130048   ;;  %s890_s21 = smov [#allocation2]  }
  0x1d   :  { %v810_v13 = vld [vmem:[%s1130_s2 + $0x50] sm:$0xff]   ;;  %v811_v14 = vld [vmem:[%s1130_s2 + $0x58] sm:$0xff]   ;;  %v812_v15 = vld [vmem:[%s1130_s2 + $0x60] sm:$0xff]   ;;  %s592_s22 = sshll.u32 %s890_s21, 4  ;;  %s593_s22 = int_to_ptr.vmem [resolvable:$true] %s592_s22 }
  0x1e   :  { %731 = vmatpush3.bf16.msra.mxu0 %v807_v8  ;;  %v813_v16 = vld [vmem:[%s1130_s2 + $0x68] sm:$0xff]   ;;  %v814_v17 = vld [vmem:[%s1130_s2 + $0x70] sm:$0xff]   ;;  %v815_v18 = vld [vmem:[%s1130_s2 + $0x78] sm:$0xff]   ;;  %v157_v57 = vshrl.u32 %v156_v49, 7  ;;  %s840_s0 = scalar_lea.vmem %s593_s22, 128  ;;  %p845_p1 = scmp.lt.s32.totalorder %s593_s22, %s593_s22 }
  0x1f   :  { %756 = vmatprep.subr.bf16.mxu0 %v888_v1  ;;  %v306_v19 = vld [vmem:[%s1129_s1] sm:$0xff]  ;;  %v817_v22 = vld [vmem:[%s1132_s4 + $0x8] sm:$0xff]   ;;  %v818_v23 = vld [vmem:[%s1132_s4 + $0x10] sm:$0xff]   ;;  %p841_p0 = scmp.ne.s32.totalorder %s593_s22, %s840_s0  ;;  %p846_p2 = scmp.lt.s32.totalorder %s840_s0, %s840_s0 }
  0x20   :  { %v307_v20 = vpack.c.bf16 %v306_v19, %v306_v19  ;;  %v816_v21 = vld [vmem:[%s1132_s4] sm:$0xff]   ;;  %v819_v24 = vld [vmem:[%s1132_s4 + $0x18] sm:$0xff]   ;;  %v821_v26 = vld [vmem:[%s1132_s4 + $0x28] sm:$0xff]   ;;  %v1041_v60 = vsub.s32 0, %v157_v57  ;;  %v1046_v63 = vsub.s32 1, %v157_v57 }
  0x21   :  { %733 = vmatmul.mubr.bf16.vlgmr.msra.gmra.mrb[0].mxu0 %v29_v10  ;;  %737 = vmatpush3.bf16.msra.mxu1 %v816_v21  ;;  %v820_v25 = vld [vmem:[%s1132_s4 + $0x20] sm:$0xff]   ;;  %v822_v27 = vld [vmem:[%s1132_s4 + $0x30] sm:$0xff]   ;;  %v823_v28 = vld [vmem:[%s1132_s4 + $0x38] sm:$0xff]   ;;  %p847_p3 = por %p846_p2, %p845_p1 }
  0x22   :  { %757 = vmatpush3.bf16.msra.mxu0 %v808_v11  ;;  %772 = vmatprep.mubr.msk.bf16.mxu0 %vm889_vm0, %v888_v1  ;;  %v30_v62 = vld [vmem:[%s1131_s3] sm:$0x3]  ;;  %v826_v21 = vld [vmem:[%s1132_s4 + $0x50] sm:$0xff]  }
  0x23   :  { %758 = vmatprep.subr.bf16.mxu0 %v888_v1  ;;  %738 = vmatprep.subr.bf16.mxu1 %v888_v1  ;;  %v159_v2 = vrot.slane %v30_v62, %v1041_v60  ;;  %v164_v6 = vrot.slane %v30_v62, %v1046_v63  ;;  %p848_p4 = pnand %p847_p3, %p841_p0 }
  0x25   :  { %739 = vmatpush3.bf16.msra.mxu1 %v817_v22 }
  0x26   :  { %759 = vmatpush3.bf16.msra.mxu0 %v809_v12  ;;  %740 = vmatprep.subr.bf16.mxu1 %v888_v1 }
  0x27   :  { %760 = vmatprep.subr.bf16.mxu0 %v888_v1 }
  0x29   :  { %741 = vmatpush3.bf16.msra.mxu1 %v818_v23 }
  0x2a   :  { %761 = vmatpush3.bf16.msra.mxu0 %v810_v13  ;;  %742 = vmatprep.subr.bf16.mxu1 %v888_v1 }
  0x2b   :  { %762 = vmatprep.subr.bf16.mxu0 %v888_v1 }
  0x2d   :  { %743 = vmatpush3.bf16.msra.mxu1 %v819_v24  ;;  %v827_v24 = vld [vmem:[%s1132_s4 + $0x58] sm:$0xff]  }
  0x2e   :  { %763 = vmatpush3.bf16.msra.mxu0 %v811_v14  ;;  %744 = vmatprep.subr.bf16.mxu1 %v888_v1  ;;  %v824_v14 = vld [vmem:[%s1132_s4 + $0x40] sm:$0xff]  }
  0x2f   :  { %764 = vmatprep.subr.bf16.mxu0 %v888_v1 }
  0x31   :  { %745 = vmatpush3.bf16.msra.mxu1 %v820_v25  ;;  %v828_v25 = vld [vmem:[%s1132_s4 + $0x60] sm:$0xff]  }
  0x32   :  { %765 = vmatpush3.bf16.msra.mxu0 %v812_v15  ;;  %746 = vmatprep.subr.bf16.mxu1 %v888_v1 }
  0x33   :  { %766 = vmatprep.subr.bf16.mxu0 %v888_v1 }
  0x35   :  { %747 = vmatpush3.bf16.msra.mxu1 %v821_v26  ;;  %v630_v26 = vld [vmem:[%s1131_s3 + $0x2] sm:$0x3] }
  0x36   :  { %767 = vmatpush3.bf16.msra.mxu0 %v813_v16  ;;  %748 = vmatprep.subr.bf16.mxu1 %v888_v1 }
  0x37   :  { %768 = vmatprep.subr.bf16.mxu0 %v888_v1 }
  0x39   :  { %749 = vmatpush3.bf16.msra.mxu1 %v822_v27  ;;  %v829_v27 = vld [vmem:[%s1132_s4 + $0x68] sm:$0xff]  }
  0x3a   :  { %769 = vmatpush3.bf16.msra.mxu0 %v814_v17  ;;  %750 = vmatprep.subr.bf16.mxu1 %v888_v1 }
  0x3b   :  { %770 = vmatprep.subr.bf16.mxu0 %v888_v1 }
  0x3d   :  { %751 = vmatpush3.bf16.msra.mxu1 %v823_v28  ;;  %v439_v28 = vrot.slane %v630_v26, %v1041_v60 }
  0x3e   :  { %771 = vmatpush3.bf16.msra.mxu0 %v815_v18  ;;  %776 = vmatprep.subr.bf16.mxu1 %v888_v1  ;;  %v825_v18 = vld [vmem:[%s1132_s4 + $0x48] sm:$0xff]  }
  0x41   :  { %773 = vmatmul.mubr.bf16.vlgmr.msra.gmra.mrb[4].mxu0 %v307_v20 }
  0xf4   :  { %v130_v29 = vpop.f32.mrb[0].mxu0 }
  0xf5   :  { %v136_v30 = vrot.slane %v130_v29, 4  ;;  %v734_v31 = vpop.f32.mrb[1].mxu0 }
  0xf6   :  { %v133_v32 = vpop.f32.mrb[2].mxu0 }
  0xf7   :  { %v137_v33 = vadd.f32 %v136_v30, %v130_v29  ;;  %v735_v34 = vpop.f32.mrb[3].mxu0  ;;  %v830_v30 = vld [vmem:[%s1132_s4 + $0x70] sm:$0xff]   ;;  %v444_v32 = vrot.slane %v630_v26, %v1046_v63 }
  0xf8   :  { %v831_v34 = vld [vmem:[%s1132_s4 + $0x78] sm:$0xff]  }
  0xf9   :  { %v138_v35 = vrot.slane %v137_v33, 2 }
  0xfb   :  { %v139_v36 = vadd.f32 %v138_v35, %v137_v33 }
  0xfd   :  { %v140_v37 = vrot.slane %v139_v36, 1 }
  0xff   :  { %v141_v38 = vadd.f32 %v140_v37, %v139_v36 }
 0x101   :  { %v143_v39 = vmul.f32 0.125, %v141_v38 }
 0x103   :  { %v144_v40 = vsub.f32 %v130_v29, %v143_v39 }
 0x105   :  { %v145_v41 = vmul.f32 %v144_v40, %v144_v40 }
 0x107   :  { %v146_v42 = vrot.slane %v145_v41, 4 }
 0x109   :  { %v147_v43 = vadd.f32 %v146_v42, %v145_v41 }
 0x10b   :  { %v148_v44 = vrot.slane %v147_v43, 2 }
 0x10d   :  { %v149_v45 = vadd.f32 %v148_v44, %v147_v43 }
 0x10f   :  { %v150_v46 = vrot.slane %v149_v45, 1 }
 0x111   :  { %v151_v47 = vadd.f32 %v150_v46, %v149_v45 }
 0x113   :  { %v152_v48 = vmul.f32 0.125, %v151_v47 }
 0x114   :  { %v411_v50 = vpop.f32.mrb[4].mxu0 }
 0x115   :  { %v153_v51 = vadd.f32 1e-05, %v152_v48  ;;  %v417_v52 = vrot.slane %v411_v50, 4  ;;  %v774_v53 = vpop.f32.mrb[5].mxu0 }
 0x116   :  { %v414_v54 = vpop.f32.mrb[6].mxu0 }
 0x117   :  { %832 = vrsqrt.f32 %v153_v51  ;;  %v418_v55 = vadd.f32 %v417_v52, %v411_v50  ;;  %v775_v56 = vpop.f32.mrb[7].mxu0 }
 0x119   :  { %v419_v58 = vrot.slane %v418_v55, 2 }
 0x11b   :  { %v420_v59 = vadd.f32 %v419_v58, %v418_v55 }
 0x11d   :  { %v421_v61 = vrot.slane %v420_v59, 1 }
 0x11f   :  { %v422_v0 = vadd.f32 %v421_v61, %v420_v59 }
 0x121   :  { %v833_v3 = vpop.eup %832  ;;  %v423_v4 = vmul.f32 0.125, %v422_v0 }
 0x122   :  { %v155_v5 = vmul.f32 %v833_v3, %v144_v40 }
 0x123   :  { %v424_v7 = vsub.f32 %v411_v50, %v423_v4 }
 0x124   :  { %v160_v8 = vmul.f32 %v159_v2, %v155_v5 }
 0x125   :  { %v425_v9 = vmul.f32 %v424_v7, %v424_v7 }
 0x126   :  { %v165_v10 = vadd.f32 %v164_v6, %v160_v8 }
 0x127   :  { %v426_v11 = vrot.slane %v425_v9, 4 }
 0x128   :  { %v166_v12 = vmax.f32 %v165_v10, 0.0 }
 0x129   :  { %v427_v13 = vadd.f32 %v426_v11, %v425_v9  ;;  %v31_v9 = vld [vmem:[%s1133_s5] sm:$0x3] }
 0x12a   :  { %v167_v15 = vpack.c.bf16 %v166_v12, %v166_v12  ;;  %v297_v12 = vrot.slane %v31_v9, %v1041_v60 }
 0x12b   :  { %v428_v16 = vrot.slane %v427_v13, 2 }
 0x12c   :  { %753 = vmatmul.mubr.bf16.vlgmr.msra.gmra.mrb[0].mxu1 %v167_v15 }
 0x12d   :  { %v429_v17 = vadd.f32 %v428_v16, %v427_v13  ;;  %777 = vmatpush3.bf16.msra.mxu1 %v824_v14  ;;  %792 = vmatprep.mubr.msk.bf16.mxu1 %vm889_vm0, %v888_v1  ;;  %v302_v16 = vrot.slane %v31_v9, %v1046_v63 }
 0x12e   :  { %778 = vmatprep.subr.bf16.mxu1 %v888_v1 }
 0x12f   :  { %v430_v19 = vrot.slane %v429_v17, 1 }
 0x131   :  { %v431_v20 = vadd.f32 %v430_v19, %v429_v17  ;;  %779 = vmatpush3.bf16.msra.mxu1 %v825_v18 }
 0x132   :  { %780 = vmatprep.subr.bf16.mxu1 %v888_v1 }
 0x133   :  { %v432_v22 = vmul.f32 0.125, %v431_v20 }
 0x135   :  { %v433_v23 = vadd.f32 1e-05, %v432_v22  ;;  %781 = vmatpush3.bf16.msra.mxu1 %v826_v21 }
 0x136   :  { %782 = vmatprep.subr.bf16.mxu1 %v888_v1 }
 0x137   :  { %834 = vrsqrt.f32 %v433_v23 }
 0x139   :  { %783 = vmatpush3.bf16.msra.mxu1 %v827_v24 }
 0x13a   :  { %784 = vmatprep.subr.bf16.mxu1 %v888_v1 }
 0x13d   :  { %785 = vmatpush3.bf16.msra.mxu1 %v828_v25 }
 0x13e   :  { %786 = vmatprep.subr.bf16.mxu1 %v888_v1 }
 0x141   :  { %v835_v29 = vpop.eup %834  ;;  %787 = vmatpush3.bf16.msra.mxu1 %v829_v27 }
 0x142   :  { %v435_v31 = vmul.f32 %v835_v29, %v424_v7  ;;  %788 = vmatprep.subr.bf16.mxu1 %v888_v1 }
 0x144   :  { %v440_v33 = vmul.f32 %v439_v28, %v435_v31 }
 0x145   :  { %789 = vmatpush3.bf16.msra.mxu1 %v830_v30 }
 0x146   :  { %790 = vmatprep.subr.bf16.mxu1 %v888_v1  ;;  %v445_v35 = vadd.f32 %v444_v32, %v440_v33 }
 0x148   :  { %v446_v36 = vmax.f32 %v445_v35, 0.0 }
 0x149   :  { %791 = vmatpush3.bf16.msra.mxu1 %v831_v34 }
 0x14a   :  { %v447_v37 = vpack.c.bf16 %v446_v36, %v446_v36 }
 0x14c   :  { %793 = vmatmul.mubr.bf16.vlgmr.msra.gmra.mrb[4].mxu1 %v447_v37 }
 0x1ff   :  { %v266_v38 = vpop.f32.mrb[0].mxu1 }
 0x200   :  { %v273_v39 = vsel %vm272_vm1, %v266_v38, 0.0  ;;  %v754_v40 = vpop.f32.mrb[1].mxu1 }
 0x201   :  { %v274_v41 = vrot.slane %v273_v39, 4  ;;  %v269_v42 = vpop.f32.mrb[2].mxu1 }
 0x202   :  { %v755_v43 = vpop.f32.mrb[3].mxu1 }
 0x203   :  { %v275_v44 = vadd.f32 %v274_v41, %v273_v39 }
 0x205   :  { %v276_v45 = vrot.slane %v275_v44, 2 }
 0x207   :  { %v277_v46 = vadd.f32 %v276_v45, %v275_v44 }
 0x209   :  { %v278_v47 = vrot.slane %v277_v46, 1 }
 0x20b   :  { %v279_v48 = vadd.f32 %v278_v47, %v277_v46 }
 0x20d   :  { %v280_v49 = vmul.f32 0.125, %v279_v48 }
 0x20f   :  { %v281_v1 = vsub.f32 %v266_v38, %v280_v49 }
 0x211   :  { %v282_v50 = vmul.f32 %v281_v1, %v281_v1 }
 0x213   :  { %v283_v51 = vsel %vm272_vm1, %v282_v50, 0.0 }
 0x214   :  { %v284_v52 = vrot.slane %v283_v51, 4 }
 0x216   :  { %v285_v53 = vadd.f32 %v284_v52, %v283_v51 }
 0x218   :  { %v286_v54 = vrot.slane %v285_v53, 2 }
 0x21a   :  { %v287_v55 = vadd.f32 %v286_v54, %v285_v53 }
 0x21c   :  { %v288_v56 = vrot.slane %v287_v55, 1 }
 0x21e   :  { %v289_v57 = vadd.f32 %v288_v56, %v287_v55 }
 0x21f   :  { %v547_v58 = vpop.f32.mrb[4].mxu1 }
 0x220   :  { %v290_v59 = vmul.f32 0.125, %v289_v57  ;;  %v553_v61 = vsel %vm272_vm1, %v547_v58, 0.0  ;;  %v794_v62 = vpop.f32.mrb[5].mxu1 }
 0x221   :  { %v554_v0 = vrot.slane %v553_v61, 4  ;;  %v550_v2 = vpop.f32.mrb[6].mxu1 }
 0x222   :  { %v291_v3 = vadd.f32 1e-05, %v290_v59  ;;  %v795_v4 = vpop.f32.mrb[7].mxu1 }
 0x223   :  { %v555_v5 = vadd.f32 %v554_v0, %v553_v61 }
 0x224   :  { %836 = vrsqrt.f32 %v291_v3 }
 0x225   :  { %v556_v6 = vrot.slane %v555_v5, 2 }
 0x227   :  { %v557_v7 = vadd.f32 %v556_v6, %v555_v5 }
 0x229   :  { %v558_v8 = vrot.slane %v557_v7, 1 }
 0x22b   :  { %v559_v10 = vadd.f32 %v558_v8, %v557_v7 }
 0x22d   :  { %v560_v11 = vmul.f32 0.125, %v559_v10 }
 0x22e   :  { %v837_v13 = vpop.eup %836 }
 0x22f   :  { %v293_v14 = vmul.f32 %v837_v13, %v281_v1  ;;  %v561_v15 = vsub.f32 %v547_v58, %v560_v11 }
 0x231   :  { %v562_v17 = vmul.f32 %v561_v15, %v561_v15  ;;  %v298_v18 = vmul.f32 %v297_v12, %v293_v14 }
 0x233   :  { %v563_v19 = vsel %vm272_vm1, %v562_v17, 0.0  ;;  %v303_v20 = vadd.f32 %v302_v16, %v298_v18 }
 0x234   :  { %v564_v21 = vrot.slane %v563_v19, 4 }
 0x235   :  { %v304_v22 = vmax.f32 %v303_v20, 0.0 }
 0x236   :  { %v565_v23 = vadd.f32 %v564_v21, %v563_v19 }
 0x237   :  { %305 = vst.msk [vmem:[#allocation2] sm:$0xff] %vm272_vm1, %v304_v22 }
 0x238   :  { %v566_v24 = vrot.slane %v565_v23, 2 }
 0x239   :  { %851 = shalt.err (!%p848_p4)
}
 0x23a   :  { %s852_s25 = scalar_lea.hbm %s1134_s6, 128 }
 0x23b   :  { %p853_p5 = scmp.ne.s32.totalorder %s1134_s6, %s852_s25  ;;  %p856_p6 = scmp.lt.u32.totalorder %s852_s25, %s1134_s6 }
 0x23d   :  { %p858_p7 = pnand %p856_p6, %p853_p5 }
 0x23f   :  { %861 = shalt.err (!%p858_p7)
}
 0x240   :  { %595 = dma.vmem_to_hbm [thread:$0]  %s593_s22, 128, %s1134_s6, [#allocation3]   ;;  %v567_v25 = vadd.f32 %v566_v24, %v565_v23  ;;  %v631_v30 = vld [vmem:[%s1133_s5 + $0x2] sm:$0x3] }
 0x241   :  { %v577_v31 = vrot.slane %v631_v30, %v1041_v60  ;;  %v582_v34 = vrot.slane %v631_v30, %v1046_v63  ;;  %s891_s11 = smov [#allocation4]  }
 0x242   :  { %v568_v26 = vrot.slane %v567_v25, 1  ;;  %s602_s12 = sshll.u32 %s891_s11, 4  ;;  %s603_s12 = int_to_ptr.vmem [resolvable:$true] %s602_s12 }
 0x243   :  { %s862_s6 = scalar_lea.vmem %s603_s12, 128  ;;  %p867_p9 = scmp.lt.s32.totalorder %s603_s12, %s603_s12 }
 0x244   :  { %v569_v27 = vadd.f32 %v568_v26, %v567_v25  ;;  %p863_p8 = scmp.ne.s32.totalorder %s603_s12, %s862_s6  ;;  %p868_p10 = scmp.lt.s32.totalorder %s862_s6, %s862_s6 }
 0x246   :  { %v570_v28 = vmul.f32 0.125, %v569_v27  ;;  %p869_p11 = por %p868_p10, %p867_p9 }
 0x248   :  { %v571_v29 = vadd.f32 1e-05, %v570_v28  ;;  %p870_p12 = pnand %p869_p11, %p863_p8 }
 0x24a   :  { %838 = vrsqrt.f32 %v571_v29 }
 0x254   :  { %v839_v32 = vpop.eup %838 }
 0x255   :  { %v573_v33 = vmul.f32 %v839_v32, %v561_v15 }
 0x257   :  { %v578_v35 = vmul.f32 %v577_v31, %v573_v33 }
 0x259   :  { %v583_v36 = vadd.f32 %v582_v34, %v578_v35 }
 0x25b   :  { %v584_v37 = vmax.f32 %v583_v36, 0.0 }
 0x25d   :  { %585 = vst.msk [vmem:[#allocation4] sm:$0xff] %vm272_vm1, %v584_v37 }
 0x25e   :  { %873 = shalt.err (!%p870_p12)
}
 0x25f   :  { %s874_s14 = scalar_lea.hbm %s1135_s7, 128 }
 0x260   :  { %p875_p13 = scmp.ne.s32.totalorder %s1135_s7, %s874_s14  ;;  %p878_p0 = scmp.lt.u32.totalorder %s874_s14, %s1135_s7 }
 0x262   :  { %p880_p1 = pnand %p878_p0, %p875_p13 }
 0x264   :  { %883 = shalt.err (!%p880_p1)
}
 0x265   :  { %605 = dma.vmem_to_hbm [thread:$0]  %s603_s12, 128, %s1135_s7, [#allocation5]  }
 0x266   :  { %884 = dma.done.wait [#allocation3], 128  }
 0x267   :  { %885 = vsyncadd [#allocation3], 4294967168 }
 0x268   :  { %886 = dma.done.wait [#allocation5], 128  }
 0x269   :  { %887 = vsyncadd [#allocation5], 4294967168 }
 0x26a   :  { %612 = vsyncpa [#allocation3], 1 }
 0x26b   :  { %613 = vsyncpa [#allocation5], 1 }

</bundles_post_ra>
